<compile_context>
chip_gen: v5e
topology: v5e:2x2
jax: 0.10.0
libtpu: 0.0.40
codegen_flags: <defaults>
</compile_context>

<pallas_src>
import functools

import numpy as np

import jax
import jax.numpy as jnp
from jax.experimental import pallas as pl
from jax.experimental.pallas import tpu as pltpu


# --------------------- per-generation tiling / VMEM budget ------------------
def _tpu_budgets():
    # (row_tile_cap, attn_tile_cap, vmem_limit_bytes)
    try:
        vmem = int(pltpu.get_tpu_info().vmem_capacity_bytes)
        if vmem <= 64 * 1024 * 1024:           # v7x-class TensorCore (64 MiB)
            return 512, 512, 40 * 1024 * 1024
        return 1024, 512, 64 * 1024 * 1024     # v5e / v6e (128 MiB)
    except Exception:
        return 512, 512, 40 * 1024 * 1024      # conservative, safe everywhere


_ROW_TILE_CAP, _ATTN_TILE_CAP, _VMEM_LIMIT = _tpu_budgets()


def _round_up(x, m):
    return ((x + m - 1) // m) * m


def _row_tile(m, cap):
    return min(cap, _round_up(m, 16))


# ----------------------------- Linear kernel (bf16 MXU) ---------------------
def _linear_kernel(x_ref, w_ref, b_ref, o_ref):
    y = jnp.dot(x_ref[...].astype(jnp.bfloat16), w_ref[...],
                preferred_element_type=jnp.float32) + b_ref[...]
    o_ref[...] = y.astype(o_ref.dtype)


def pallas_linear(x, w, b, out_dtype=None):
    m, k = x.shape
    n_out = w.shape[1]
    out_dtype = out_dtype or x.dtype
    tm = _row_tile(m, _ROW_TILE_CAP)
    return pl.pallas_call(
        _linear_kernel,
        out_shape=jax.ShapeDtypeStruct((m, n_out), out_dtype),
        grid_spec=pltpu.PrefetchScalarGridSpec(
            num_scalar_prefetch=0,
            grid=(pl.cdiv(m, tm),),
            in_specs=[
                pl.BlockSpec((tm, k), lambda i: (i, 0)),
                pl.BlockSpec((k, n_out), lambda i: (0, 0)),
                pl.BlockSpec((1, n_out), lambda i: (0, 0)),
            ],
            out_specs=pl.BlockSpec((tm, n_out), lambda i: (i, 0)),
        ),
        compiler_params=pltpu.CompilerParams(
            dimension_semantics=("parallel",),
            vmem_limit_bytes=_VMEM_LIMIT),
    )(x, w.astype(jnp.bfloat16), b.reshape(1, n_out))


# -------- attention core FUSED with output_proj + residual + LayerNorm1 -----
# Inputs are lane-dense:
#   logits  : (M, H*LP)         column = h*LP + (l*P + p)           (f32)
#   sampled : (M, LP*d_model)   column = q*d_model + h*Dh + c        (bf16)
#   expand  : (H*LP, LP*d_model) 0/1 replicating head weights over Dh lanes
#   hmask   : (H*LP, H*LP)       block-diagonal 0/1 (per-head softmax denom)
def _attn_out_norm_kernel(lg_ref, samp_ref, exp_ref, hmask_ref, ow_ref, ob_ref,
                          res_ref, g_ref, be_ref, o_ref, *, lp, d_model, eps):
    lg = lg_ref[...]                                         # (tm, HLP) f32
    mx = jnp.max(lg, axis=-1, keepdims=True)                 # shared stabilizer
    e = jnp.exp(lg - mx)                                     # one wide EUP exp
    # per-head denominators via block-diagonal bf16 matmul (no slicing/concat)
    denom = jnp.dot(e.astype(jnp.bfloat16), hmask_ref[...],
                    preferred_element_type=jnp.float32)      # (tm, HLP)
    w = (e * pl.reciprocal(denom, approx=True)).astype(jnp.bfloat16)

    # fused point reduction: never materialize a (tm, LP*d) intermediate
    acc = None
    for q in range(lp):
        wq = jnp.dot(w, exp_ref[:, q * d_model:(q + 1) * d_model],
                     preferred_element_type=jnp.float32)     # (tm, d)
        sq = samp_ref[:, q * d_model:(q + 1) * d_model].astype(jnp.float32)
        contrib = wq * sq
        acc = contrib if acc is None else acc + contrib

    # fused output projection + residual + LayerNorm1
    y = jnp.dot(acc.astype(jnp.bfloat16), ow_ref[...],
                preferred_element_type=jnp.float32) + ob_ref[...]
    h = y + res_ref[...].astype(jnp.float32)
    mean = jnp.mean(h, axis=-1, keepdims=True)
    var = jnp.mean(h * h, axis=-1, keepdims=True) - mean * mean
    yn = (h - mean) * jax.lax.rsqrt(var + eps)
    o_ref[...] = (yn * g_ref[...] + be_ref[...]).astype(o_ref.dtype)


def pallas_attn_out_norm(logits, sampled, expand, hmask, out_w, out_b,
                         residual, gamma, beta, *, lp, d_model, eps=1e-5):
    m, hlp = logits.shape
    tm = _row_tile(m, _ATTN_TILE_CAP)
    return pl.pallas_call(
        functools.partial(_attn_out_norm_kernel, lp=lp, d_model=d_model, eps=eps),
        out_shape=jax.ShapeDtypeStruct((m, d_model), residual.dtype),
        grid_spec=pltpu.PrefetchScalarGridSpec(
            num_scalar_prefetch=0,
            grid=(pl.cdiv(m, tm),),
            in_specs=[
                pl.BlockSpec((tm, hlp), lambda i: (i, 0)),
                pl.BlockSpec((tm, lp * d_model), lambda i: (i, 0)),
                pl.BlockSpec((hlp, lp * d_model), lambda i: (0, 0)),
                pl.BlockSpec((hlp, hlp), lambda i: (0, 0)),
                pl.BlockSpec((d_model, d_model), lambda i: (0, 0)),
                pl.BlockSpec((1, d_model), lambda i: (0, 0)),
                pl.BlockSpec((tm, d_model), lambda i: (i, 0)),
                pl.BlockSpec((1, d_model), lambda i: (0, 0)),
                pl.BlockSpec((1, d_model), lambda i: (0, 0)),
            ],
            out_specs=pl.BlockSpec((tm, d_model), lambda i: (i, 0)),
        ),
        compiler_params=pltpu.CompilerParams(
            dimension_semantics=("parallel",),
            vmem_limit_bytes=_VMEM_LIMIT),
    )(logits, sampled, expand, hmask,
      out_w.astype(jnp.bfloat16), out_b.reshape(1, d_model),
      residual, gamma.reshape(1, d_model), beta.reshape(1, d_model))


@functools.lru_cache(maxsize=None)
def _attn_constants(n_heads, lp, dh):
    d = n_heads * dh
    hlp = n_heads * lp
    expand = np.zeros((hlp, lp * d), np.float32)
    hmask = np.zeros((hlp, hlp), np.float32)
    for hh in range(n_heads):
        for q in range(lp):
            r = hh * lp + q
            expand[r, q * d + hh * dh: q * d + (hh + 1) * dh] = 1.0
            hmask[r, hh * lp:(hh + 1) * lp] = 1.0
    return jnp.asarray(expand, jnp.bfloat16), jnp.asarray(hmask, jnp.bfloat16)


# ---------- fused FFN: linear1 + ReLU + linear2 + residual + LayerNorm ------
def _ffn_addnorm_kernel(x_ref, w1_ref, b1_ref, w2_ref, b2_ref, g_ref, be_ref,
                        o_ref, *, eps):
    x = x_ref[...]
    h = jnp.dot(x.astype(jnp.bfloat16), w1_ref[...],
                preferred_element_type=jnp.float32) + b1_ref[...]
    h = jnp.maximum(h, 0.0)
    y = jnp.dot(h.astype(jnp.bfloat16), w2_ref[...],
                preferred_element_type=jnp.float32) + b2_ref[...]
    y = y + x.astype(jnp.float32)
    mean = jnp.mean(y, axis=-1, keepdims=True)
    var = jnp.mean(y * y, axis=-1, keepdims=True) - mean * mean
    yn = (y - mean) * jax.lax.rsqrt(var + eps)
    o_ref[...] = (yn * g_ref[...] + be_ref[...]).astype(o_ref.dtype)


def pallas_ffn_addnorm(x, w1, b1, w2, b2, gamma, beta, eps=1e-5):
    m, d = x.shape
    d_ffn = w1.shape[1]
    tm = _row_tile(m, _ROW_TILE_CAP)
    # bf16 weights with constant index_map: DMA'd into VMEM once and kept
    # resident across all row tiles (no per-tile weight re-stream).
    # TODO(synk): tile the d_ffn reduction if bf16 weights ever exceed the VMEM
    # budget (d_ffn >> 8k); current configs fit comfortably.
    return pl.pallas_call(
        functools.partial(_ffn_addnorm_kernel, eps=eps),
        out_shape=jax.ShapeDtypeStruct((m, d), x.dtype),
        grid_spec=pltpu.PrefetchScalarGridSpec(
            num_scalar_prefetch=0,
            grid=(pl.cdiv(m, tm),),
            in_specs=[
                pl.BlockSpec((tm, d), lambda i: (i, 0)),
                pl.BlockSpec((d, d_ffn), lambda i: (0, 0)),
                pl.BlockSpec((1, d_ffn), lambda i: (0, 0)),
                pl.BlockSpec((d_ffn, d), lambda i: (0, 0)),
                pl.BlockSpec((1, d), lambda i: (0, 0)),
                pl.BlockSpec((1, d), lambda i: (0, 0)),
                pl.BlockSpec((1, d), lambda i: (0, 0)),
            ],
            out_specs=pl.BlockSpec((tm, d), lambda i: (i, 0)),
        ),
        compiler_params=pltpu.CompilerParams(
            dimension_semantics=("parallel",),
            vmem_limit_bytes=_VMEM_LIMIT),
    )(x, w1.astype(jnp.bfloat16), b1.reshape(1, d_ffn),
      w2.astype(jnp.bfloat16), b2.reshape(1, d),
      gamma.reshape(1, d), beta.reshape(1, d))


# ---------------- bilinear sampling (grid_sample, zeros, align_corners=False)
# TODO(synk): data-dependent gather of MSDeformAttn kept in plain JAX (XLA
# gather); full fusion into the attention-core kernel (scalar-prefetched level
# offsets + per-point DMA) is the next step.  One gather per level (4 corners
# stacked), validity folded into the corner weights, one post-blend transpose;
# a single bf16 tensor is materialized in point-major (N, Lq, L*P, H, Dh).
def ms_deform_sample(value, spatial_shapes_py, sampling_locations):
    # value: (N, Len_in, H, Dh) bf16; sampling_locations: (N, Lq, H, L, P, 2) in [0,1]
    n, _, h, dh = value.shape
    _, lq, _, _, p, _ = sampling_locations.shape
    outs = []
    start = 0
    for lvl, (hl, wl) in enumerate(spatial_shapes_py):
        s = hl * wl
        v = jnp.transpose(value[:, start:start + s], (0, 2, 1, 3))   # (N, H, S, Dh)
        start += s
        loc = sampling_locations[:, :, :, lvl]                        # (N, Lq, H, P, 2)
        x = loc[..., 0] * wl - 0.5
        y = loc[..., 1] * hl - 0.5
        x0 = jnp.floor(x)
        y0 = jnp.floor(y)
        wx1 = x - x0
        wx0 = 1.0 - wx1
        wy1 = y - y0
        wy0 = 1.0 - wy1

        def corner(yc, xc, wgt):
            valid = (xc >= 0) & (xc <= wl - 1) & (yc >= 0) & (yc <= hl - 1)
            idx = (jnp.clip(yc, 0, hl - 1).astype(jnp.int32) * wl
                   + jnp.clip(xc, 0, wl - 1).astype(jnp.int32))       # (N,Lq,H,P)
            return idx, jnp.where(valid, wgt, 0.0)

        i00, w00 = corner(y0, x0, wy0 * wx0)
        i01, w01 = corner(y0, x0 + 1.0, wy0 * wx1)
        i10, w10 = corner(y0 + 1.0, x0, wy1 * wx0)
        i11, w11 = corner(y0 + 1.0, x0 + 1.0, wy1 * wx1)

        idx4 = jnp.stack([i00, i01, i10, i11], axis=-1)               # (N,Lq,H,P,4)
        wgt4 = jnp.stack([w00, w01, w10, w11], axis=-1)
        idx4 = jnp.transpose(idx4, (0, 2, 1, 3, 4)).reshape(n, h, lq * p * 4)
        wgt4 = jnp.transpose(wgt4, (0, 2, 1, 3, 4)).reshape(n, h, lq * p * 4, 1)

        g = jnp.take_along_axis(v, idx4[..., None], axis=2)           # (N,H,Lq*P*4,Dh)
        g = (g.astype(jnp.float32) * wgt4).reshape(n, h, lq, p, 4, dh)
        samp = jnp.sum(g, axis=4)                                     # (N,H,Lq,P,Dh)
        outs.append(jnp.transpose(samp, (0, 2, 3, 1, 4)).astype(jnp.bfloat16))
    return jnp.concatenate(outs, axis=2)                              # (N,Lq,L*P,H,Dh)


# ------------------------------- full layer ---------------------------------
def deformable_encoder_layer(params, src, pos, reference_points,
                             spatial_shapes_py, n_heads, n_levels, n_points):
    n, lq, d = src.shape
    dh = d // n_heads
    lp = n_levels * n_points
    hlp = n_heads * lp
    m = n * lq

    src2d = src.reshape(m, d)
    q2d = (src + pos).reshape(m, d)                           # with_pos_embed

    # value projection (bf16 output halves gather traffic)
    value = pallas_linear(src2d, params["value_w"], params["value_b"],
                          out_dtype=jnp.bfloat16).reshape(n, lq, n_heads, dh)

    # fused sampling_offsets + attention_weights projection (single q2d pass)
    cat_w = jnp.concatenate([params["off_w"], params["attn_w"]], axis=1)
    cat_b = jnp.concatenate([params["off_b"], params["attn_b"]], axis=0)
    qproj = pallas_linear(q2d, cat_w, cat_b)                  # (m, 3*hlp)
    n_off = hlp * 2
    offsets = qproj[:, :n_off].reshape(n, lq, n_heads, n_levels, n_points, 2)
    logits = qproj[:, n_off:]                                 # (m, hlp)

    # sampling locations: ref + offset / [W_l, H_l]
    ss = jnp.asarray(spatial_shapes_py, dtype=jnp.float32)    # (L, 2) = (H, W)
    offset_norm = jnp.stack([ss[:, 1], ss[:, 0]], axis=-1)    # (L, 2) = (W, H)
    loc = (reference_points[:, :, None, :, None, :]
           + offsets / offset_norm[None, None, None, :, None, :])

    sampled = ms_deform_sample(value, spatial_shapes_py, loc).reshape(m, lp * d)

    expand, hmask = _attn_constants(n_heads, lp, dh)          # cached bf16 consts

    # attention core + output_proj + residual + LayerNorm1 (one fused kernel)
    x = pallas_attn_out_norm(logits, sampled, expand, hmask,
                             params["out_w"], params["out_b"],
                             src2d, params["ln1_g"], params["ln1_b"],
                             lp=lp, d_model=d)

    # FFN fused: norm2(x + linear2(relu(linear1(x))))
    out = pallas_ffn_addnorm(x, params["lin1_w"], params["lin1_b"],
                             params["lin2_w"], params["lin2_b"],
                             params["ln2_g"], params["ln2_b"])
    return out.reshape(n, lq, d)


def init_params(key, d_model, d_ffn, n_heads, n_levels, n_points):
    ks = jax.random.split(key, 12)

    def dense(k, fi, fo, scale=0.05):
        return scale * jax.random.normal(k, (fi, fo), jnp.float32)

    hlp = n_heads * n_levels * n_points
    return {
        "value_w": dense(ks[0], d_model, d_model),
        "value_b": 0.01 * jax.random.normal(ks[1], (d_model,), jnp.float32),
        "off_w": dense(ks[2], d_model, hlp * 2),
        "off_b": 0.5 * jax.random.normal(ks[3], (hlp * 2,), jnp.float32),
        "attn_w": dense(ks[4], d_model, hlp),
        "attn_b": 0.01 * jax.random.normal(ks[5], (hlp,), jnp.float32),
        "out_w": dense(ks[6], d_model, d_model),
        "out_b": jnp.zeros((d_model,), jnp.float32),
        "ln1_g": jnp.ones((d_model,), jnp.float32),
        "ln1_b": jnp.zeros((d_model,), jnp.float32),
        "lin1_w": dense(ks[7], d_model, d_ffn),
        "lin1_b": 0.01 * jax.random.normal(ks[8], (d_ffn,), jnp.float32),
        "lin2_w": dense(ks[9], d_ffn, d_model),
        "lin2_b": 0.01 * jax.random.normal(ks[10], (d_model,), jnp.float32),
        "ln2_g": jnp.ones((d_model,), jnp.float32),
        "ln2_b": jnp.zeros((d_model,), jnp.float32),
    }


if __name__ == "__main__":
    d_model, d_ffn = 128, 256
    n_levels, n_heads, n_points = 2, 4, 2
    spatial_shapes_py = [(8, 8), (4, 4)]                      # (H_l, W_l)
    batch = 2
    seq = sum(h * w for h, w in spatial_shapes_py)            # 80

    key = jax.random.PRNGKey(0)
    k_src, k_pos, k_par = jax.random.split(key, 3)
    src = jax.random.normal(k_src, (batch, seq, d_model), jnp.float32)
    pos = jax.random.normal(k_pos, (batch, seq, d_model), jnp.float32)

    # encoder-style reference points: normalized cell centers of each level
    refs = []
    for hl, wl in spatial_shapes_py:
        ys, xs = jnp.meshgrid(
            (jnp.arange(hl, dtype=jnp.float32) + 0.5) / hl,
            (jnp.arange(wl, dtype=jnp.float32) + 0.5) / wl,
            indexing="ij")
        refs.append(jnp.stack([xs.reshape(-1), ys.reshape(-1)], axis=-1))
    ref = jnp.concatenate(refs, axis=0)                        # (seq, 2)
    reference_points = jnp.broadcast_to(
        ref[None, :, None, :], (batch, seq, n_levels, 2))

    params = init_params(k_par, d_model, d_ffn, n_heads, n_levels, n_points)

    out = deformable_encoder_layer(params, src, pos, reference_points,
                                   spatial_shapes_py, n_heads, n_levels,
                                   n_points)
    out = jax.block_until_ready(out)
    assert out.shape == (batch, seq, d_model)
    assert bool(jnp.all(jnp.isfinite(out)))
    print("KERNEL_OK")
</pallas_src>

<mosaic_0001>
module attributes {stable_mosaic.version = 11 : i64} {
  func.func @_linear_kernel(%arg0: i32, %arg1: memref<160x128xf32, #tpu.memory_space<vmem>>, %arg2: memref<128x128xbf16, #tpu.memory_space<vmem>>, %arg3: memref<1x128xf32, #tpu.memory_space<vmem>>, %arg4: memref<160x128xbf16, #tpu.memory_space<vmem>>) attributes {dimension_semantics = [#tpu.dimension_semantics<parallel>], iteration_bounds = array<i64: 1>, scalar_prefetch = 0 : i64, scratch_operands = 0 : i64, tpu.core_type = #tpu.core_type<tc>, window_params = [{transform_indices = @transform_0, window_bounds = array<i64: 160, 128>}, {pipeline_mode = #tpu.pipeline_mode<synchronous>, transform_indices = @transform_1, window_bounds = array<i64: 128, 128>}, {pipeline_mode = #tpu.pipeline_mode<synchronous>, transform_indices = @transform_2, window_bounds = array<i64: 1, 128>}, {transform_indices = @transform_3, window_bounds = array<i64: 160, 128>}]} {
    %c0 = arith.constant 0 : index
    %c0_0 = arith.constant 0 : index
    %0 = vector.load %arg1[%c0, %c0_0] : memref<160x128xf32, #tpu.memory_space<vmem>>, vector<160x128xf32>
    %1 = arith.truncf %0 : vector<160x128xf32> to vector<160x128xbf16>
    %c0_1 = arith.constant 0 : index
    %c0_2 = arith.constant 0 : index
    %2 = vector.load %arg2[%c0_1, %c0_2] : memref<128x128xbf16, #tpu.memory_space<vmem>>, vector<128x128xbf16>
    %cst = arith.constant dense<0.000000e+00> : vector<160x128xf32>
    %3 = tpu.matmul %1, %2, %cst {dimension_numbers = #tpu.dot_dimension_numbers<[1], [0], [0], [1], [0, 0, 1, 1], [], []>} : vector<160x128xbf16>, vector<128x128xbf16>, vector<160x128xf32> -> vector<160x128xf32>
    %c0_3 = arith.constant 0 : index
    %c0_4 = arith.constant 0 : index
    %4 = vector.load %arg3[%c0_3, %c0_4] : memref<1x128xf32, #tpu.memory_space<vmem>>, vector<1x128xf32>
    %5 = vector.broadcast %4 : vector<1x128xf32> to vector<160x128xf32>
    %6 = arith.addf %3, %5 : vector<160x128xf32>
    %7 = arith.truncf %6 : vector<160x128xf32> to vector<160x128xbf16>
    %c0_5 = arith.constant 0 : index
    %c0_6 = arith.constant 0 : index
    %8 = vector.load %arg4[%c0_5, %c0_6] : memref<160x128xbf16, #tpu.memory_space<vmem>>, vector<160x128xbf16>
    tpu.vector_store %arg4[%c0_5, %c0_6], %7 {strides = array<i32>} : memref<160x128xbf16, #tpu.memory_space<vmem>>, vector<160x128xbf16>,
    return
  }
  func.func @transform_0(%arg0: i32) -> (i32, i32) {
    %c0_i32 = arith.constant 0 : i32
    %c0_i32_0 = arith.constant 0 : i32
    return %arg0, %c0_i32 : i32, i32
  }
  func.func @transform_1(%arg0: i32) -> (i32, i32) {
    %c0_i32 = arith.constant 0 : i32
    %c0_i32_0 = arith.constant 0 : i32
    %c0_i32_1 = arith.constant 0 : i32
    return %c0_i32, %c0_i32_0 : i32, i32
  }
  func.func @transform_2(%arg0: i32) -> (i32, i32) {
    %c0_i32 = arith.constant 0 : i32
    %c0_i32_0 = arith.constant 0 : i32
    %c0_i32_1 = arith.constant 0 : i32
    return %c0_i32, %c0_i32_0 : i32, i32
  }
  func.func @transform_3(%arg0: i32) -> (i32, i32) {
    %c0_i32 = arith.constant 0 : i32
    %c0_i32_0 = arith.constant 0 : i32
    return %arg0, %c0_i32 : i32, i32
  }
}

</mosaic_0001>

<bundles_post_ra>
// kernel: tpu_custom_call.1
= control target key start
LH: loop header
LB: loop body
LE: loop exit
PB: predicated region body
PF: predicated region fallthrough
CT: control target
= control target key end

     0   :  { %8 = vsyncpa [#allocation3], 0  ;;  %s518_s0 = inlined_call_operand.hbm [shape: f32[160,128], index: 0, kind: input, shape index: {}]   ;;  %s519_s1 = inlined_call_operand.hbm [shape: bf16[128,128], index: 1, kind: input, shape index: {}]   ;;  %s520_s2 = inlined_call_operand.vmem [shape: f32[1,128], index: 2, kind: input, shape index: {}]   ;;  %s521_s3 = inlined_call_operand.hbm [shape: bf16[160,128], index: 3, kind: output, shape index: {}]  }
   0x1   :  { %9 = vsyncpa [#allocation6], 0 }
   0x2   :  { %10 = vsyncpa [#allocation4], 0  ;;  %s15_s14 = sshll.u32 %s518_s0, 4  ;;  %s473_s15 = smov [#allocation2]   ;;  %s16_s14 = int_to_ptr.hbm [resolvable:$true] %s15_s14 }
   0x3   :  { %s17_s16 = sshll.u32 %s473_s15, 4  ;;  %s28_s19 = sshll.u32 %s519_s1, 4  ;;  %s18_s16 = int_to_ptr.vmem [resolvable:$true] %s17_s16  ;;  %s29_s19 = int_to_ptr.hbm [resolvable:$true] %s28_s19 }
   0x4   :  { %s474_s20 = smov 128   ;;  %s475_s21 = smov 8  }
   0x5   :  { %23 = dma.hbm_to_vmem [thread:$0]  %s16_s14, 2560, %s18_s16, [#allocation3], %s474_s20, %s474_s20, %s475_s21  }
   0x6   :  { %s476_s22 = smov [#allocation5]   ;;  %s477_s24 = smov 64  }
   0x7   :  { %s30_s23 = sshll.u32 %s476_s22, 4  ;;  %s478_s25 = smov 4   ;;  %s31_s23 = int_to_ptr.vmem [resolvable:$true] %s30_s23 }
   0x8   :  { %36 = dma.hbm_to_vmem [thread:$0]  %s29_s19, 1024, %s31_s23, [#allocation6], %s477_s24, %s477_s24, %s478_s25  }
   0x9   :  { %467 = dma.done.wait [#allocation3], 2560  }
   0xa   :  { %468 = vsyncadd [#allocation3], 4294964736 }
   0xb   :  { %469 = dma.done.wait [#allocation6], 1024  }
   0xc   :  { %470 = vsyncadd [#allocation6], 4294966272  ;;  %v303_v0 = vld [vmem:[#allocation5 + $0x38] sm:$0xff]  ;;  %v302_v1 = vld [vmem:[#allocation5 + $0x30] sm:$0xff]  ;;  %s250_s29 = sshll.u32 %s521_s3, 4  ;;  %s251_s29 = int_to_ptr.hbm [resolvable:$true] %s250_s29 }
   0xd   :  { %364 = vmatpush.bf16.msra.mxu2 %v303_v0  ;;  %365 = vmatpush.bf16.msra.mxu3 %v303_v0  ;;  %v301_v2 = vld [vmem:[#allocation5 + $0x28] sm:$0xff]  ;;  %v300_v3 = vld [vmem:[#allocation5 + $0x20] sm:$0xff]  ;;  %v299_v4 = vld [vmem:[#allocation5 + $0x18] sm:$0xff] }
   0xe   :  { %145 = vmatpush.bf16.msra.mxu0 %v303_v0  ;;  %363 = vmatpush.bf16.msra.mxu1 %v303_v0  ;;  %v298_v5 = vld [vmem:[#allocation5 + $0x10] sm:$0xff]  ;;  %v297_v6 = vld [vmem:[#allocation5 + $0x8] sm:$0xff]  ;;  %v296_v7 = vld [vmem:[#allocation5] sm:$0xff] }
   0xf   :  { %v55_v8 = vld [vmem:[#allocation2 + $0x40] sm:$0xff]  ;;  %v56_v9 = vld [vmem:[#allocation2 + $0x48] sm:$0xff]  ;;  %v61_v10 = vld [vmem:[#allocation2 + $0x70] sm:$0xff] }
  0x10   :  { %v62_v11 = vld [vmem:[#allocation2 + $0x78] sm:$0xff]  ;;  %v47_v12 = vld [vmem:[#allocation2] sm:$0xff]  ;;  %v48_v13 = vld [vmem:[#allocation2 + $0x8] sm:$0xff]  ;;  %v71_v16 = vpack.c.bf16 %v56_v9, %v55_v8 }
  0x11   :  { %367 = vmatpush.bf16.msra.mxu2 %v302_v1  ;;  %368 = vmatpush.bf16.msra.mxu3 %v302_v1  ;;  %v51_v14 = vld [vmem:[#allocation2 + $0x20] sm:$0xff]  ;;  %v52_v15 = vld [vmem:[#allocation2 + $0x28] sm:$0xff]  ;;  %v74_v17 = vpack.c.bf16 %v62_v11, %v61_v10  ;;  %v67_v18 = vpack.c.bf16 %v48_v13, %v47_v12  ;;  %v57_v20 = vld [vmem:[#allocation2 + $0x50] sm:$0xff] }
  0x12   :  { %146 = vmatpush.bf16.msra.mxu0 %v302_v1  ;;  %366 = vmatpush.bf16.msra.mxu1 %v302_v1  ;;  %v69_v19 = vpack.c.bf16 %v52_v15, %v51_v14  ;;  %v58_v21 = vld [vmem:[#allocation2 + $0x58] sm:$0xff]  ;;  %v63_v22 = vld [vmem:[#allocation2 + $0x80] sm:$0xff]  ;;  %v64_v23 = vld [vmem:[#allocation2 + $0x88] sm:$0xff] }
  0x13   :  { %v49_v24 = vld [vmem:[#allocation2 + $0x10] sm:$0xff]  ;;  %v50_v25 = vld [vmem:[#allocation2 + $0x18] sm:$0xff]  ;;  %v72_v28 = vpack.c.bf16 %v58_v21, %v57_v20  ;;  %v75_v29 = vpack.c.bf16 %v64_v23, %v63_v22  ;;  %v59_v32 = vld [vmem:[#allocation2 + $0x60] sm:$0xff] }
  0x14   :  { %v53_v26 = vld [vmem:[#allocation2 + $0x30] sm:$0xff]  ;;  %v54_v27 = vld [vmem:[#allocation2 + $0x38] sm:$0xff]  ;;  %v68_v30 = vpack.c.bf16 %v50_v25, %v49_v24  ;;  %v60_v33 = vld [vmem:[#allocation2 + $0x68] sm:$0xff] }
  0x15   :  { %370 = vmatpush.bf16.msra.mxu2 %v301_v2  ;;  %371 = vmatpush.bf16.msra.mxu3 %v301_v2  ;;  %v70_v31 = vpack.c.bf16 %v54_v27, %v53_v26  ;;  %v65_v34 = vld [vmem:[#allocation2 + $0x90] sm:$0xff]  ;;  %v66_v35 = vld [vmem:[#allocation2 + $0x98] sm:$0xff]  ;;  %v73_v36 = vpack.c.bf16 %v60_v33, %v59_v32  ;;  %v394_v40 = vld [vmem:[%s520_s2] ss:$0 sm:$0xff]  ;;  %s479_s2 = smov [#allocation7]  }
  0x16   :  { %147 = vmatpush.bf16.msra.mxu0 %v301_v2  ;;  %369 = vmatpush.bf16.msra.mxu1 %v301_v2  ;;  %v76_v37 = vpack.c.bf16 %v66_v35, %v65_v34  ;;  %s248_s26 = sshll.u32 %s479_s2, 4  ;;  %s249_s26 = int_to_ptr.vmem [resolvable:$true] %s248_s26 }
  0x19   :  { %373 = vmatpush.bf16.msra.mxu2 %v300_v3  ;;  %374 = vmatpush.bf16.msra.mxu3 %v300_v3 }
  0x1a   :  { %148 = vmatpush.bf16.msra.mxu0 %v300_v3  ;;  %372 = vmatpush.bf16.msra.mxu1 %v300_v3 }
  0x1d   :  { %376 = vmatpush.bf16.msra.mxu2 %v299_v4  ;;  %377 = vmatpush.bf16.msra.mxu3 %v299_v4 }
  0x1e   :  { %149 = vmatpush.bf16.msra.mxu0 %v299_v4  ;;  %375 = vmatpush.bf16.msra.mxu1 %v299_v4 }
  0x21   :  { %379 = vmatpush.bf16.msra.mxu2 %v298_v5  ;;  %380 = vmatpush.bf16.msra.mxu3 %v298_v5 }
  0x22   :  { %150 = vmatpush.bf16.msra.mxu0 %v298_v5  ;;  %378 = vmatpush.bf16.msra.mxu1 %v298_v5 }
  0x25   :  { %382 = vmatpush.bf16.msra.mxu2 %v297_v6  ;;  %383 = vmatpush.bf16.msra.mxu3 %v297_v6 }
  0x26   :  { %151 = vmatpush.bf16.msra.mxu0 %v297_v6  ;;  %381 = vmatpush.bf16.msra.mxu1 %v297_v6 }
  0x29   :  { %385 = vmatpush.bf16.msra.mxu2 %v296_v7  ;;  %386 = vmatpush.bf16.msra.mxu3 %v296_v7 }
  0x2a   :  { %152 = vmatpush.bf16.msra.mxu0 %v296_v7  ;;  %384 = vmatpush.bf16.msra.mxu1 %v296_v7 }
  0x2c   :  { %173 = vmatmul.bf16.vlgmr.msra.gmra.mxu2 %v71_v16  ;;  %188 = vmatmul.bf16.vlgmr.msra.gmra.mxu3 %v74_v17 }
  0x2d   :  { %153 = vmatmul.bf16.vlgmr.msra.gmra.mxu0 %v67_v18  ;;  %163 = vmatmul.bf16.vlgmr.msra.gmra.mxu1 %v69_v19 }
  0x3c   :  { %178 = vmatmul.bf16.gmra.mxu2 %v72_v28  ;;  %193 = vmatmul.bf16.gmra.mxu3 %v75_v29 }
  0x3d   :  { %158 = vmatmul.bf16.gmra.mxu0 %v68_v30  ;;  %168 = vmatmul.bf16.gmra.mxu1 %v70_v31 }
  0x4c   :  { %183 = vmatmul.bf16.gmra.mxu2 %v73_v36  ;;  %198 = vmatmul.bf16.gmra.mxu3 %v76_v37 }
  0xaa   :  { %v154_v38 = vpop.f32.mrf.mxu0  ;;  %v164_v39 = vpop.f32.mrf.mxu1 }
  0xab   :  { %v155_v43 = vadd.f32 %v394_v40, %v154_v38  ;;  %v165_v44 = vadd.f32 %v394_v40, %v164_v39 }
  0xaf   :  { %v174_v41 = vpop.f32.mrf.mxu2  ;;  %v189_v42 = vpop.f32.mrf.mxu3 }
  0xb0   :  { %v175_v53 = vadd.f32 %v394_v40, %v174_v41  ;;  %v190_v54 = vadd.f32 %v394_v40, %v189_v42 }
  0xb2   :  { %v156_v45 = vpop.f32.mrf.mxu0  ;;  %v166_v46 = vpop.f32.mrf.mxu1 }
  0xb3   :  { %v157_v47 = vadd.f32 %v394_v40, %v156_v45  ;;  %v167_v48 = vadd.f32 %v394_v40, %v166_v46 }
  0xb5   :  { %v307_v49 = vpack.c.bf16 %v157_v47, %v155_v43  ;;  %v317_v50 = vpack.c.bf16 %v167_v48, %v165_v44 }
  0xb7   :  { %v176_v51 = vpop.f32.mrf.mxu2  ;;  %v191_v52 = vpop.f32.mrf.mxu3  ;;  %308 = vst [vmem:[#allocation7] sm:$0xff] %v307_v49  }
  0xb8   :  { %v177_v55 = vadd.f32 %v394_v40, %v176_v51  ;;  %v192_v56 = vadd.f32 %v394_v40, %v191_v52  ;;  %355 = vst [vmem:[#allocation7 + $0x10] sm:$0xff] %v317_v50  }
  0xba   :  { %v327_v57 = vpack.c.bf16 %v177_v55, %v175_v53  ;;  %v342_v58 = vpack.c.bf16 %v192_v56, %v190_v54  ;;  %v159_v59 = vpop.f32.mrf.mxu0  ;;  %v169_v60 = vpop.f32.mrf.mxu1 }
  0xbb   :  { %v160_v63 = vadd.f32 %v394_v40, %v159_v59  ;;  %v170_v0 = vadd.f32 %v394_v40, %v169_v60 }
  0xbc   :  { %357 = vst [vmem:[#allocation7 + $0x20] sm:$0xff] %v327_v57  }
  0xbd   :  { %360 = vst [vmem:[#allocation7 + $0x38] sm:$0xff] %v342_v58  }
  0xbf   :  { %v179_v61 = vpop.f32.mrf.mxu2  ;;  %v194_v62 = vpop.f32.mrf.mxu3 }
  0xc0   :  { %v180_v9 = vadd.f32 %v394_v40, %v179_v61  ;;  %v195_v10 = vadd.f32 %v394_v40, %v194_v62 }
  0xc2   :  { %v161_v1 = vpop.f32.mrf.mxu0  ;;  %v171_v2 = vpop.f32.mrf.mxu1 }
  0xc3   :  { %v162_v3 = vadd.f32 %v394_v40, %v161_v1  ;;  %v172_v4 = vadd.f32 %v394_v40, %v171_v2 }
  0xc5   :  { %v312_v5 = vpack.c.bf16 %v162_v3, %v160_v63  ;;  %v322_v6 = vpack.c.bf16 %v172_v4, %v170_v0 }
  0xc7   :  { %v181_v7 = vpop.f32.mrf.mxu2  ;;  %v196_v8 = vpop.f32.mrf.mxu3  ;;  %354 = vst [vmem:[#allocation7 + $0x8] sm:$0xff] %v312_v5  }
  0xc8   :  { %v182_v11 = vadd.f32 %v394_v40, %v181_v7  ;;  %v197_v12 = vadd.f32 %v394_v40, %v196_v8  ;;  %356 = vst [vmem:[#allocation7 + $0x18] sm:$0xff] %v322_v6  }
  0xca   :  { %v332_v13 = vpack.c.bf16 %v182_v11, %v180_v9  ;;  %v347_v14 = vpack.c.bf16 %v197_v12, %v195_v10 }
  0xcc   :  { %358 = vst [vmem:[#allocation7 + $0x28] sm:$0xff] %v332_v13  }
  0xcd   :  { %361 = vst [vmem:[#allocation7 + $0x40] sm:$0xff] %v347_v14  }
  0xcf   :  { %v184_v15 = vpop.f32.mrf.mxu2  ;;  %v199_v16 = vpop.f32.mrf.mxu3 }
  0xd0   :  { %v185_v19 = vadd.f32 %v394_v40, %v184_v15  ;;  %v200_v20 = vadd.f32 %v394_v40, %v199_v16 }
  0xd7   :  { %v186_v17 = vpop.f32.mrf.mxu2  ;;  %v201_v18 = vpop.f32.mrf.mxu3 }
  0xd8   :  { %v187_v21 = vadd.f32 %v394_v40, %v186_v17  ;;  %v202_v22 = vadd.f32 %v394_v40, %v201_v18 }
  0xda   :  { %v337_v23 = vpack.c.bf16 %v187_v21, %v185_v19  ;;  %v352_v24 = vpack.c.bf16 %v202_v22, %v200_v20 }
  0xdc   :  { %359 = vst [vmem:[#allocation7 + $0x30] sm:$0xff] %v337_v23  }
  0xdd   :  { %362 = vst [vmem:[#allocation7 + $0x48] sm:$0xff] %v352_v24  }
  0xde   :  { %256 = dma.vmem_to_hbm [thread:$0]  %s249_s26, 1280, %s251_s29, [#allocation4], %s477_s24, %s477_s24, %s478_s25  }
  0xdf   :  { %471 = dma.done.wait [#allocation4], 1280  }
  0xe0   :  { %472 = vsyncadd [#allocation4], 4294966016 }
  0xe1   :  { %261 = vsyncpa [#allocation3], 1 }
  0xe2   :  { %262 = vsyncpa [#allocation6], 1 }
  0xe3   :  { %263 = vsyncpa [#allocation4], 1 }

</bundles_post_ra>
